<compile_context>
chip_gen: v7x
topology: tpu7x:2x2x1
jax: 0.10.0
libtpu: 0.0.40
codegen_flags: <defaults>
</compile_context>

<pallas_src>
import functools

import jax
import jax.numpy as jnp
import numpy as np
from jax import lax
from jax.experimental import pallas as pl
from jax.experimental.pallas import tpu as pltpu


def _round_up(n, m):
    return ((n + m - 1) // m) * m


def _convlstm_kernel(comb_ref, w_ref, b_ref, c_ref, h_out_ref, c_out_ref,
                     patch_ref, *, kh, kw, H, W, hidden_dim, cin_p, bblk):
    """One batch *block* (bblk images) per grid step.

    comb_ref : (bblk, Cin_p, Hp*Wp + kw-1)  flattened, spatially padded cat([x,h])
    w_ref    : (4*hidden, K)                K = kh*kw*Cin_p, (dy,dx,ci)-major
    b_ref    : (4*hidden, 1)                bias (f32)
    c_ref    : (1, hidden, bblk*H*Wp)       cell state, batch fused on lanes
    h_out_ref: (1, hidden, bblk*H*Wp)
    c_out_ref: (1, hidden, bblk*H*Wp)
    patch_ref: VMEM (K, bblk*H*Wp)          staged im2col operand (compute dtype)
    """
    Wp = W + kw - 1
    HWp = H * Wp

    # im2col staging: every (b, dy, dx) offset is ONE contiguous lane-shifted
    # window of the flattened padded input (the kw-1 trailing slack lanes keep
    # the window in bounds) -> bblk*kh*kw wide lane-dense copies, no
    # (C,H,W)->(C,HW) reshape relayouts.  Sublane store offsets are 8-aligned
    # because Cin_p is a multiple of 8.
    for b in range(bblk):
        for dy in range(kh):
            for dx in range(kw):
                off = dy * kw + dx
                start = dy * Wp + dx
                patch_ref[off * cin_p:(off + 1) * cin_p,
                          b * HWp:(b + 1) * HWp] = comb_ref[b, :, start:start + HWp]

    # Single MXU contraction for the whole batch block, f32 accumulation.
    acc = jnp.dot(w_ref[...], patch_ref[...],
                  preferred_element_type=jnp.float32)        # (4*hidden, bblk*HWp)

    # The reference module applies sigmoid to ALL four gates (g included):
    # bias fold + sigmoid in one lane-dense pass over the whole slab.
    gates = jax.nn.sigmoid(acc + b_ref[...])

    hd = hidden_dim
    i = gates[0 * hd:1 * hd, :]
    f = gates[1 * hd:2 * hd, :]
    o = gates[2 * hd:3 * hd, :]
    g = gates[3 * hd:4 * hd, :]

    c_cur = c_ref[0].astype(jnp.float32)                     # (hidden, bblk*HWp)
    c_next = f * c_cur + i * g
    h_next = o * jnp.maximum(c_next, 0.0)                    # relu, per reference

    # Lane-dense stores; the kw-1 garbage columns per image row are sliced off
    # in the wrapper.
    h_out_ref[0] = h_next.astype(h_out_ref.dtype)
    c_out_ref[0] = c_next.astype(c_out_ref.dtype)


def prepare_convlstm_params(weight_oihw, bias, *, input_dim, hidden_dim,
                            compute_dtype=jnp.bfloat16):
    """Once-per-model weight/bias relayout (hoist OUT of any recurrent loop).

    OIHW -> (Cout, kh*kw*Cin_p), contraction axis (dy, dx, ci)-major to match
    the in-kernel im2col staging; channels zero-padded to a sublane multiple;
    weights cast to the MXU compute dtype, bias kept in f32.
    """
    cout, cin, kh, kw = weight_oihw.shape
    assert cin == input_dim + hidden_dim
    cin_p = _round_up(cin, 8)
    w2d = jnp.transpose(weight_oihw, (0, 2, 3, 1)).astype(compute_dtype)
    w2d = jnp.pad(w2d, ((0, 0), (0, 0), (0, 0), (0, cin_p - cin)))
    w2d = w2d.reshape(cout, kh * kw * cin_p)
    b2d = bias.reshape(cout, 1).astype(jnp.float32)
    return w2d, b2d


def convlstm_cell_forward(x, h_cur, c_cur, weight_oihw, bias, *, hidden_dim,
                          kernel_size, compute_dtype=jnp.bfloat16,
                          batch_block=None, prepared_params=None):
    """Pallas ConvLSTMCell forward. Inputs/outputs follow PyTorch NCHW.

    compute_dtype: dtype of the MXU operands (bf16 default; accumulation and
    gate math are always f32).  prepared_params: optional (w2d, b2d) from
    prepare_convlstm_params to skip the per-call weight relayout.
    """
    kh, kw = kernel_size
    ph, pw = kh // 2, kw // 2
    B, Cx, H, W = x.shape
    Ch = h_cur.shape[1]
    assert Ch == hidden_dim
    Cin = Cx + Ch
    Cout = 4 * hidden_dim

    Cin_p = _round_up(Cin, 8)          # sublane-aligned channel blocks
    Hp, Wp = H + kh - 1, W + kw - 1
    HWp = H * Wp                       # W valid + kw-1 garbage columns per row
    K = kh * kw * Cin_p

    if batch_block is None:
        # Amortize per-grid-step overhead over a few images while keeping
        # >=2 grid steps (both v7x TensorCores busy) and the f32 gate slab
        # comfortably inside the 64-entry vreg file.
        batch_block = max(1, min(2, B // 2))
    Bblk = batch_block
    G = -(-B // Bblk)                  # number of grid steps
    Bp = G * Bblk                      # batch padded to a block multiple

    if prepared_params is None:
        prepared_params = prepare_convlstm_params(
            weight_oihw, bias, input_dim=Cx, hidden_dim=hidden_dim,
            compute_dtype=compute_dtype)
    w2d, b2d = prepared_params

    # cat([x,h]) on channels (native NCHW, no transposes), pad channels to a
    # sublane multiple, add the "same" spatial halo, flatten rows onto the
    # lane axis and append kw-1 lanes of slack so every in-kernel shifted
    # window is a contiguous slice.
    # TODO(synk): for a recurrent loop, fold this concat/pad into the kernel's
    # im2col staging (pass x and h separately) and keep h/c in the flat
    # slacked layout across timesteps so these per-step XLA HBM passes vanish.
    comb = jnp.concatenate([x, h_cur], axis=1).astype(compute_dtype)
    comb = jnp.pad(comb, ((0, Bp - B), (0, Cin_p - Cin), (ph, ph), (pw, pw)))
    comb_flat = comb.reshape(Bp, Cin_p, Hp * Wp)
    comb_flat = jnp.pad(comb_flat, ((0, 0), (0, 0), (0, kw - 1)))

    # Cell state: channels-major, row-flattened with slack, batch block fused
    # onto the lane axis -> (G, hidden, Bblk*HWp).
    c_flat = jnp.pad(c_cur.astype(jnp.float32),
                     ((0, Bp - B), (0, 0), (0, 0), (0, kw - 1)))
    c_flat = c_flat.reshape(G, Bblk, Ch, HWp)
    c_flat = jnp.transpose(c_flat, (0, 2, 1, 3)).reshape(G, Ch, Bblk * HWp)

    kernel = functools.partial(_convlstm_kernel, kh=kh, kw=kw, H=H, W=W,
                               hidden_dim=hidden_dim, cin_p=Cin_p, bblk=Bblk)

    # VMEM budgeting (double-buffered blocks + scratch); raise the scoped
    # limit only as needed and cap at v7x's 64 MiB physical VMEM.
    itemsize = jnp.dtype(compute_dtype).itemsize
    comb_blk_bytes = Bblk * Cin_p * (Hp * Wp + kw - 1) * itemsize
    state_blk_bytes = Ch * Bblk * HWp * 4
    scratch_bytes = K * Bblk * HWp * itemsize
    vmem_est = (2 * comb_blk_bytes + 2 * (Cout * K * itemsize + Cout * 4)
                + 3 * 2 * state_blk_bytes + scratch_bytes)
    vmem_limit = int(min(64 * 2**20, max(32 * 2**20, 2 * vmem_est)))

    cost = pl.CostEstimate(
        flops=2 * Cout * K * Bp * HWp + 5 * Ch * Bp * HWp,
        transcendentals=Cout * Bp * HWp,
        bytes_accessed=(Bp * Cin_p * (Hp * Wp + kw - 1) * itemsize
                        + Cout * K * itemsize + Cout * 4
                        + 3 * Bp * Ch * HWp * 4))

    h_flat, c_next_flat = pl.pallas_call(
        kernel,
        grid=(G,),
        in_specs=[
            pl.BlockSpec((Bblk, Cin_p, Hp * Wp + kw - 1), lambda g: (g, 0, 0)),
            pl.BlockSpec((Cout, K), lambda g: (0, 0)),
            pl.BlockSpec((Cout, 1), lambda g: (0, 0)),
            pl.BlockSpec((1, Ch, Bblk * HWp), lambda g: (g, 0, 0)),
        ],
        out_specs=[
            pl.BlockSpec((1, Ch, Bblk * HWp), lambda g: (g, 0, 0)),
            pl.BlockSpec((1, Ch, Bblk * HWp), lambda g: (g, 0, 0)),
        ],
        out_shape=(
            jax.ShapeDtypeStruct((G, Ch, Bblk * HWp), jnp.float32),
            jax.ShapeDtypeStruct((G, Ch, Bblk * HWp), jnp.float32),
        ),
        scratch_shapes=[pltpu.VMEM((K, Bblk * HWp), compute_dtype)],
        # Recurrent-friendly: reuse the c-state HBM buffer for c_next.
        input_output_aliases={3: 1},
        cost_estimate=cost,
        compiler_params=pltpu.CompilerParams(
            dimension_semantics=("parallel",),
            vmem_limit_bytes=vmem_limit),
    )(comb_flat, w2d, b2d, c_flat)

    # Back to NCHW: drop the kw-1 garbage columns per row and any batch pad.
    def _unflatten(t):
        t = t.reshape(G, Ch, Bblk, H, Wp)
        t = jnp.transpose(t, (0, 2, 1, 3, 4)).reshape(Bp, Ch, H, Wp)
        return t[:B, :, :, :W]

    return _unflatten(h_flat), _unflatten(c_next_flat)


def _reference_forward(x, h, c, w_oihw, bias, *, hidden_dim, kernel_size):
    """Pure-JAX NCHW reference mirroring the PyTorch module exactly."""
    kh, kw = kernel_size
    combined = jnp.concatenate([x, h], axis=1)
    conv = lax.conv_general_dilated(
        combined, w_oihw,
        window_strides=(1, 1),
        padding=((kh // 2, kh // 2), (kw // 2, kw // 2)),
        dimension_numbers=("NCHW", "OIHW", "NCHW"))
    conv = conv + bias.reshape(1, -1, 1, 1)
    cc_i, cc_f, cc_o, cc_g = jnp.split(conv, 4, axis=1)
    i = jax.nn.sigmoid(cc_i)
    f = jax.nn.sigmoid(cc_f)
    o = jax.nn.sigmoid(cc_o)
    g = jax.nn.sigmoid(cc_g)
    c_next = f * c + i * g
    h_next = o * jnp.maximum(c_next, 0.0)
    return h_next, c_next


if __name__ == "__main__":
    # Module config (small, consistent with the PyTorch __init__).
    input_size = (16, 16)
    input_dim = 4
    hidden_dim = 8
    kernel_size = (3, 3)
    batch = 4          # exercises batch_block=2 -> 2 "parallel" grid steps

    H, W = input_size
    cin_total = input_dim + hidden_dim
    cout = 4 * hidden_dim

    key = jax.random.PRNGKey(0)
    kx, kh_, kc, kw_, kb = jax.random.split(key, 5)

    # Deterministic parameter init (PyTorch Conv2d-style uniform bounds).
    fan_in = cin_total * kernel_size[0] * kernel_size[1]
    bound = 1.0 / np.sqrt(fan_in)
    weight = jax.random.uniform(kw_, (cout, cin_total, *kernel_size),
                                jnp.float32, -bound, bound)   # OIHW
    bias = jax.random.uniform(kb, (cout,), jnp.float32, -bound, bound)

    # Inputs (NCHW, matching PyTorch convention).
    x = jax.random.normal(kx, (batch, input_dim, H, W), jnp.float32)
    h_cur = jax.random.normal(kh_, (batch, hidden_dim, H, W), jnp.float32)
    c_cur = jax.random.normal(kc, (batch, hidden_dim, H, W), jnp.float32)

    h_ref, c_ref = _reference_forward(
        x, h_cur, c_cur, weight, bias,
        hidden_dim=hidden_dim, kernel_size=kernel_size)

    # Default bf16 MXU-operand path (f32 accumulation / gate math).
    fwd_bf16 = jax.jit(functools.partial(convlstm_cell_forward,
                                         hidden_dim=hidden_dim,
                                         kernel_size=kernel_size,
                                         compute_dtype=jnp.bfloat16))
    h_bf16, c_bf16 = fwd_bf16(x, h_cur, c_cur, weight, bias)
    jax.block_until_ready((h_bf16, c_bf16))
    np.testing.assert_allclose(np.asarray(h_bf16), np.asarray(h_ref),
                               rtol=5e-2, atol=5e-2)
    np.testing.assert_allclose(np.asarray(c_bf16), np.asarray(c_ref),
                               rtol=5e-2, atol=5e-2)

    # Exact f32 path: tight tolerance.
    fwd_f32 = jax.jit(functools.partial(convlstm_cell_forward,
                                        hidden_dim=hidden_dim,
                                        kernel_size=kernel_size,
                                        compute_dtype=jnp.float32))
    h_f32, c_f32 = fwd_f32(x, h_cur, c_cur, weight, bias)
    jax.block_until_ready((h_f32, c_f32))
    np.testing.assert_allclose(np.asarray(h_f32), np.asarray(h_ref),
                               rtol=1e-5, atol=1e-5)
    np.testing.assert_allclose(np.asarray(c_f32), np.asarray(c_ref),
                               rtol=1e-5, atol=1e-5)

    print("KERNEL_OK")
</pallas_src>

<mosaic_0001>
module attributes {stable_mosaic.version = 11 : i64} {
  func.func @_convlstm_kernel(%arg0: i32, %arg1: memref<2x16x326xbf16, #tpu.memory_space<vmem>>, %arg2: memref<32x144xbf16, #tpu.memory_space<vmem>>, %arg3: memref<32x1xf32, #tpu.memory_space<vmem>>, %arg4: memref<1x8x576xf32, #tpu.memory_space<vmem>>, %arg5: memref<1x8x576xf32, #tpu.memory_space<vmem>>, %arg6: memref<1x8x576xf32, #tpu.memory_space<vmem>>, %arg7: memref<144x576xbf16, #tpu.memory_space<vmem>>) attributes {dimension_semantics = [#tpu.dimension_semantics<parallel>], iteration_bounds = array<i64: 2>, scalar_prefetch = 0 : i64, scratch_operands = 1 : i64, tpu.core_type = #tpu.core_type<tc>, window_params = [{transform_indices = @transform_0, window_bounds = array<i64: 2, 16, 326>}, {pipeline_mode = #tpu.pipeline_mode<synchronous>, transform_indices = @transform_1, window_bounds = array<i64: 32, 144>}, {pipeline_mode = #tpu.pipeline_mode<synchronous>, transform_indices = @transform_2, window_bounds = array<i64: 32, 1>}, {transform_indices = @transform_3, window_bounds = array<i64: 1, 8, 576>}, {transform_indices = @transform_4, window_bounds = array<i64: 1, 8, 576>}, {transform_indices = @transform_5, window_bounds = array<i64: 1, 8, 576>}]} {
    %c0 = arith.constant 0 : index
    %c0_0 = arith.constant 0 : index
    %c0_1 = arith.constant 0 : index
    %0 = vector.load %arg1[%c0, %c0_0, %c0_1] : memref<2x16x326xbf16, #tpu.memory_space<vmem>>, vector<1x16x288xbf16>
    %1 = vector.shape_cast %0 : vector<1x16x288xbf16> to vector<16x288xbf16>
    %c0_2 = arith.constant 0 : index
    %c0_3 = arith.constant 0 : index
    %2 = vector.load %arg7[%c0_2, %c0_3] : memref<144x576xbf16, #tpu.memory_space<vmem>>, vector<16x288xbf16>
    tpu.vector_store %arg7[%c0_2, %c0_3], %1 {strides = array<i32>} : memref<144x576xbf16, #tpu.memory_space<vmem>>, vector<16x288xbf16>,
    %c0_4 = arith.constant 0 : index
    %c0_5 = arith.constant 0 : index
    %c1 = arith.constant 1 : index
    %3 = vector.load %arg1[%c0_4, %c0_5, %c1] : memref<2x16x326xbf16, #tpu.memory_space<vmem>>, vector<1x16x288xbf16>
    %4 = vector.shape_cast %3 : vector<1x16x288xbf16> to vector<16x288xbf16>
    %c16 = arith.constant 16 : index
    %c0_6 = arith.constant 0 : index
    %5 = vector.load %arg7[%c16, %c0_6] : memref<144x576xbf16, #tpu.memory_space<vmem>>, vector<16x288xbf16>
    tpu.vector_store %arg7[%c16, %c0_6], %4 {strides = array<i32>} : memref<144x576xbf16, #tpu.memory_space<vmem>>, vector<16x288xbf16>,
    %c0_7 = arith.constant 0 : index
    %c0_8 = arith.constant 0 : index
    %c2 = arith.constant 2 : index
    %6 = vector.load %arg1[%c0_7, %c0_8, %c2] : memref<2x16x326xbf16, #tpu.memory_space<vmem>>, vector<1x16x288xbf16>
    %7 = vector.shape_cast %6 : vector<1x16x288xbf16> to vector<16x288xbf16>
    %c32 = arith.constant 32 : index
    %c0_9 = arith.constant 0 : index
    %8 = vector.load %arg7[%c32, %c0_9] : memref<144x576xbf16, #tpu.memory_space<vmem>>, vector<16x288xbf16>
    tpu.vector_store %arg7[%c32, %c0_9], %7 {strides = array<i32>} : memref<144x576xbf16, #tpu.memory_space<vmem>>, vector<16x288xbf16>,
    %c0_10 = arith.constant 0 : index
    %c0_11 = arith.constant 0 : index
    %c18 = arith.constant 18 : index
    %9 = vector.load %arg1[%c0_10, %c0_11, %c18] : memref<2x16x326xbf16, #tpu.memory_space<vmem>>, vector<1x16x288xbf16>
    %10 = vector.shape_cast %9 : vector<1x16x288xbf16> to vector<16x288xbf16>
    %c48 = arith.constant 48 : index
    %c0_12 = arith.constant 0 : index
    %11 = vector.load %arg7[%c48, %c0_12] : memref<144x576xbf16, #tpu.memory_space<vmem>>, vector<16x288xbf16>
    tpu.vector_store %arg7[%c48, %c0_12], %10 {strides = array<i32>} : memref<144x576xbf16, #tpu.memory_space<vmem>>, vector<16x288xbf16>,
    %c0_13 = arith.constant 0 : index
    %c0_14 = arith.constant 0 : index
    %c19 = arith.constant 19 : index
    %12 = vector.load %arg1[%c0_13, %c0_14, %c19] : memref<2x16x326xbf16, #tpu.memory_space<vmem>>, vector<1x16x288xbf16>
    %13 = vector.shape_cast %12 : vector<1x16x288xbf16> to vector<16x288xbf16>
    %c64 = arith.constant 64 : index
    %c0_15 = arith.constant 0 : index
    %14 = vector.load %arg7[%c64, %c0_15] : memref<144x576xbf16, #tpu.memory_space<vmem>>, vector<16x288xbf16>
    tpu.vector_store %arg7[%c64, %c0_15], %13 {strides = array<i32>} : memref<144x576xbf16, #tpu.memory_space<vmem>>, vector<16x288xbf16>,
    %c0_16 = arith.constant 0 : index
    %c0_17 = arith.constant 0 : index
    %c20 = arith.constant 20 : index
    %15 = vector.load %arg1[%c0_16, %c0_17, %c20] : memref<2x16x326xbf16, #tpu.memory_space<vmem>>, vector<1x16x288xbf16>
    %16 = vector.shape_cast %15 : vector<1x16x288xbf16> to vector<16x288xbf16>
    %c80 = arith.constant 80 : index
    %c0_18 = arith.constant 0 : index
    %17 = vector.load %arg7[%c80, %c0_18] : memref<144x576xbf16, #tpu.memory_space<vmem>>, vector<16x288xbf16>
    tpu.vector_store %arg7[%c80, %c0_18], %16 {strides = array<i32>} : memref<144x576xbf16, #tpu.memory_space<vmem>>, vector<16x288xbf16>,
    %c0_19 = arith.constant 0 : index
    %c0_20 = arith.constant 0 : index
    %c36 = arith.constant 36 : index
    %18 = vector.load %arg1[%c0_19, %c0_20, %c36] : memref<2x16x326xbf16, #tpu.memory_space<vmem>>, vector<1x16x288xbf16>
    %19 = vector.shape_cast %18 : vector<1x16x288xbf16> to vector<16x288xbf16>
    %c96 = arith.constant 96 : index
    %c0_21 = arith.constant 0 : index
    %20 = vector.load %arg7[%c96, %c0_21] : memref<144x576xbf16, #tpu.memory_space<vmem>>, vector<16x288xbf16>
    tpu.vector_store %arg7[%c96, %c0_21], %19 {strides = array<i32>} : memref<144x576xbf16, #tpu.memory_space<vmem>>, vector<16x288xbf16>,
    %c0_22 = arith.constant 0 : index
    %c0_23 = arith.constant 0 : index
    %c37 = arith.constant 37 : index
    %21 = vector.load %arg1[%c0_22, %c0_23, %c37] : memref<2x16x326xbf16, #tpu.memory_space<vmem>>, vector<1x16x288xbf16>
    %22 = vector.shape_cast %21 : vector<1x16x288xbf16> to vector<16x288xbf16>
    %c112 = arith.constant 112 : index
    %c0_24 = arith.constant 0 : index
    %23 = vector.load %arg7[%c112, %c0_24] : memref<144x576xbf16, #tpu.memory_space<vmem>>, vector<16x288xbf16>
    tpu.vector_store %arg7[%c112, %c0_24], %22 {strides = array<i32>} : memref<144x576xbf16, #tpu.memory_space<vmem>>, vector<16x288xbf16>,
    %c0_25 = arith.constant 0 : index
    %c0_26 = arith.constant 0 : index
    %c38 = arith.constant 38 : index
    %24 = vector.load %arg1[%c0_25, %c0_26, %c38] : memref<2x16x326xbf16, #tpu.memory_space<vmem>>, vector<1x16x288xbf16>
    %25 = vector.shape_cast %24 : vector<1x16x288xbf16> to vector<16x288xbf16>
    %c128 = arith.constant 128 : index
    %c0_27 = arith.constant 0 : index
    %26 = vector.load %arg7[%c128, %c0_27] : memref<144x576xbf16, #tpu.memory_space<vmem>>, vector<16x288xbf16>
    tpu.vector_store %arg7[%c128, %c0_27], %25 {strides = array<i32>} : memref<144x576xbf16, #tpu.memory_space<vmem>>, vector<16x288xbf16>,
    %c1_28 = arith.constant 1 : index
    %c0_29 = arith.constant 0 : index
    %c0_30 = arith.constant 0 : index
    %27 = vector.load %arg1[%c1_28, %c0_29, %c0_30] : memref<2x16x326xbf16, #tpu.memory_space<vmem>>, vector<1x16x288xbf16>
    %28 = vector.shape_cast %27 : vector<1x16x288xbf16> to vector<16x288xbf16>
    %c0_31 = arith.constant 0 : index
    %c288 = arith.constant 288 : index
    %29 = vector.load %arg7[%c0_31, %c288] : memref<144x576xbf16, #tpu.memory_space<vmem>>, vector<16x288xbf16>
    tpu.vector_store %arg7[%c0_31, %c288], %28 {strides = array<i32>} : memref<144x576xbf16, #tpu.memory_space<vmem>>, vector<16x288xbf16>,
    %c1_32 = arith.constant 1 : index
    %c0_33 = arith.constant 0 : index
    %c1_34 = arith.constant 1 : index
    %30 = vector.load %arg1[%c1_32, %c0_33, %c1_34] : memref<2x16x326xbf16, #tpu.memory_space<vmem>>, vector<1x16x288xbf16>
    %31 = vector.shape_cast %30 : vector<1x16x288xbf16> to vector<16x288xbf16>
    %c16_35 = arith.constant 16 : index
    %c288_36 = arith.constant 288 : index
    %32 = vector.load %arg7[%c16_35, %c288_36] : memref<144x576xbf16, #tpu.memory_space<vmem>>, vector<16x288xbf16>
    tpu.vector_store %arg7[%c16_35, %c288_36], %31 {strides = array<i32>} : memref<144x576xbf16, #tpu.memory_space<vmem>>, vector<16x288xbf16>,
    %c1_37 = arith.constant 1 : index
    %c0_38 = arith.constant 0 : index
    %c2_39 = arith.constant 2 : index
    %33 = vector.load %arg1[%c1_37, %c0_38, %c2_39] : memref<2x16x326xbf16, #tpu.memory_space<vmem>>, vector<1x16x288xbf16>
    %34 = vector.shape_cast %33 : vector<1x16x288xbf16> to vector<16x288xbf16>
    %c32_40 = arith.constant 32 : index
    %c288_41 = arith.constant 288 : index
    %35 = vector.load %arg7[%c32_40, %c288_41] : memref<144x576xbf16, #tpu.memory_space<vmem>>, vector<16x288xbf16>
    tpu.vector_store %arg7[%c32_40, %c288_41], %34 {strides = array<i32>} : memref<144x576xbf16, #tpu.memory_space<vmem>>, vector<16x288xbf16>,
    %c1_42 = arith.constant 1 : index
    %c0_43 = arith.constant 0 : index
    %c18_44 = arith.constant 18 : index
    %36 = vector.load %arg1[%c1_42, %c0_43, %c18_44] : memref<2x16x326xbf16, #tpu.memory_space<vmem>>, vector<1x16x288xbf16>
    %37 = vector.shape_cast %36 : vector<1x16x288xbf16> to vector<16x288xbf16>
    %c48_45 = arith.constant 48 : index
    %c288_46 = arith.constant 288 : index
    %38 = vector.load %arg7[%c48_45, %c288_46] : memref<144x576xbf16, #tpu.memory_space<vmem>>, vector<16x288xbf16>
    tpu.vector_store %arg7[%c48_45, %c288_46], %37 {strides = array<i32>} : memref<144x576xbf16, #tpu.memory_space<vmem>>, vector<16x288xbf16>,
    %c1_47 = arith.constant 1 : index
    %c0_48 = arith.constant 0 : index
    %c19_49 = arith.constant 19 : index
    %39 = vector.load %arg1[%c1_47, %c0_48, %c19_49] : memref<2x16x326xbf16, #tpu.memory_space<vmem>>, vector<1x16x288xbf16>
    %40 = vector.shape_cast %39 : vector<1x16x288xbf16> to vector<16x288xbf16>
    %c64_50 = arith.constant 64 : index
    %c288_51 = arith.constant 288 : index
    %41 = vector.load %arg7[%c64_50, %c288_51] : memref<144x576xbf16, #tpu.memory_space<vmem>>, vector<16x288xbf16>
    tpu.vector_store %arg7[%c64_50, %c288_51], %40 {strides = array<i32>} : memref<144x576xbf16, #tpu.memory_space<vmem>>, vector<16x288xbf16>,
    %c1_52 = arith.constant 1 : index
    %c0_53 = arith.constant 0 : index
    %c20_54 = arith.constant 20 : index
    %42 = vector.load %arg1[%c1_52, %c0_53, %c20_54] : memref<2x16x326xbf16, #tpu.memory_space<vmem>>, vector<1x16x288xbf16>
    %43 = vector.shape_cast %42 : vector<1x16x288xbf16> to vector<16x288xbf16>
    %c80_55 = arith.constant 80 : index
    %c288_56 = arith.constant 288 : index
    %44 = vector.load %arg7[%c80_55, %c288_56] : memref<144x576xbf16, #tpu.memory_space<vmem>>, vector<16x288xbf16>
    tpu.vector_store %arg7[%c80_55, %c288_56], %43 {strides = array<i32>} : memref<144x576xbf16, #tpu.memory_space<vmem>>, vector<16x288xbf16>,
    %c1_57 = arith.constant 1 : index
    %c0_58 = arith.constant 0 : index
    %c36_59 = arith.constant 36 : index
    %45 = vector.load %arg1[%c1_57, %c0_58, %c36_59] : memref<2x16x326xbf16, #tpu.memory_space<vmem>>, vector<1x16x288xbf16>
    %46 = vector.shape_cast %45 : vector<1x16x288xbf16> to vector<16x288xbf16>
    %c96_60 = arith.constant 96 : index
    %c288_61 = arith.constant 288 : index
    %47 = vector.load %arg7[%c96_60, %c288_61] : memref<144x576xbf16, #tpu.memory_space<vmem>>, vector<16x288xbf16>
    tpu.vector_store %arg7[%c96_60, %c288_61], %46 {strides = array<i32>} : memref<144x576xbf16, #tpu.memory_space<vmem>>, vector<16x288xbf16>,
    %c1_62 = arith.constant 1 : index
    %c0_63 = arith.constant 0 : index
    %c37_64 = arith.constant 37 : index
    %48 = vector.load %arg1[%c1_62, %c0_63, %c37_64] : memref<2x16x326xbf16, #tpu.memory_space<vmem>>, vector<1x16x288xbf16>
    %49 = vector.shape_cast %48 : vector<1x16x288xbf16> to vector<16x288xbf16>
    %c112_65 = arith.constant 112 : index
    %c288_66 = arith.constant 288 : index
    %50 = vector.load %arg7[%c112_65, %c288_66] : memref<144x576xbf16, #tpu.memory_space<vmem>>, vector<16x288xbf16>
    tpu.vector_store %arg7[%c112_65, %c288_66], %49 {strides = array<i32>} : memref<144x576xbf16, #tpu.memory_space<vmem>>, vector<16x288xbf16>,
    %c1_67 = arith.constant 1 : index
    %c0_68 = arith.constant 0 : index
    %c38_69 = arith.constant 38 : index
    %51 = vector.load %arg1[%c1_67, %c0_68, %c38_69] : memref<2x16x326xbf16, #tpu.memory_space<vmem>>, vector<1x16x288xbf16>
    %52 = vector.shape_cast %51 : vector<1x16x288xbf16> to vector<16x288xbf16>
    %c128_70 = arith.constant 128 : index
    %c288_71 = arith.constant 288 : index
    %53 = vector.load %arg7[%c128_70, %c288_71] : memref<144x576xbf16, #tpu.memory_space<vmem>>, vector<16x288xbf16>
    tpu.vector_store %arg7[%c128_70, %c288_71], %52 {strides = array<i32>} : memref<144x576xbf16, #tpu.memory_space<vmem>>, vector<16x288xbf16>,
    %c0_72 = arith.constant 0 : index
    %c0_73 = arith.constant 0 : index
    %54 = vector.load %arg2[%c0_72, %c0_73] : memref<32x144xbf16, #tpu.memory_space<vmem>>, vector<32x144xbf16>
    %c0_74 = arith.constant 0 : index
    %c0_75 = arith.constant 0 : index
    %55 = vector.load %arg7[%c0_74, %c0_75] : memref<144x576xbf16, #tpu.memory_space<vmem>>, vector<144x576xbf16>
    %cst = arith.constant dense<0.000000e+00> : vector<32x576xf32>
    %56 = tpu.matmul %54, %55, %cst {dimension_numbers = #tpu.dot_dimension_numbers<[1], [0], [0], [1], [0, 0, 1, 1], [], []>} : vector<32x144xbf16>, vector<144x576xbf16>, vector<32x576xf32> -> vector<32x576xf32>
    %c0_76 = arith.constant 0 : index
    %c0_77 = arith.constant 0 : index
    %57 = vector.load %arg3[%c0_76, %c0_77] : memref<32x1xf32, #tpu.memory_space<vmem>>, vector<32x1xf32>
    %58 = vector.broadcast %57 : vector<32x1xf32> to vector<32x576xf32>
    %59 = arith.addf %56, %58 : vector<32x576xf32>
    %60 = arith.negf %59 : vector<32x576xf32>
    %61 = math.exp %60 : vector<32x576xf32>
    %cst_78 = arith.constant 1.000000e+00 : f32
    %62 = vector.broadcast %cst_78 : f32 to vector<32x576xf32>
    %63 = arith.addf %62, %61 : vector<32x576xf32>
    %64 = arith.divf %62, %63 : vector<32x576xf32>
    %65 = vector.extract_strided_slice %64 {offsets = [0, 0], sizes = [8, 576], strides = [1, 1]} : vector<32x576xf32> to vector<8x576xf32>
    %66 = vector.extract_strided_slice %64 {offsets = [8, 0], sizes = [8, 576], strides = [1, 1]} : vector<32x576xf32> to vector<8x576xf32>
    %67 = vector.extract_strided_slice %64 {offsets = [16, 0], sizes = [8, 576], strides = [1, 1]} : vector<32x576xf32> to vector<8x576xf32>
    %68 = vector.extract_strided_slice %64 {offsets = [24, 0], sizes = [8, 576], strides = [1, 1]} : vector<32x576xf32> to vector<8x576xf32>
    %c0_79 = arith.constant 0 : index
    %c0_80 = arith.constant 0 : index
    %c0_81 = arith.constant 0 : index
    %69 = vector.load %arg4[%c0_79, %c0_80, %c0_81] : memref<1x8x576xf32, #tpu.memory_space<vmem>>, vector<1x8x576xf32>
    %70 = vector.shape_cast %69 : vector<1x8x576xf32> to vector<8x576xf32>
    %71 = arith.mulf %66, %70 : vector<8x576xf32>
    %72 = arith.mulf %65, %68 : vector<8x576xf32>
    %73 = arith.addf %71, %72 : vector<8x576xf32>
    %cst_82 = arith.constant 0.000000e+00 : f32
    %74 = vector.broadcast %cst_82 : f32 to vector<8x576xf32>
    %75 = arith.maximumf %73, %74 : vector<8x576xf32>
    %76 = arith.mulf %67, %75 : vector<8x576xf32>
    %c0_83 = arith.constant 0 : index
    %c0_84 = arith.constant 0 : index
    %c0_85 = arith.constant 0 : index
    %77 = vector.load %arg5[%c0_83, %c0_84, %c0_85] : memref<1x8x576xf32, #tpu.memory_space<vmem>>, vector<1x8x576xf32>
    %78 = vector.shape_cast %77 : vector<1x8x576xf32> to vector<8x576xf32>
    %79 = vector.shape_cast %76 : vector<8x576xf32> to vector<1x8x576xf32>
    tpu.vector_store %arg5[%c0_83, %c0_84, %c0_85], %79 {strides = array<i32>} : memref<1x8x576xf32, #tpu.memory_space<vmem>>, vector<1x8x576xf32>,
    %c0_86 = arith.constant 0 : index
    %c0_87 = arith.constant 0 : index
    %c0_88 = arith.constant 0 : index
    %80 = vector.load %arg6[%c0_86, %c0_87, %c0_88] : memref<1x8x576xf32, #tpu.memory_space<vmem>>, vector<1x8x576xf32>
    %81 = vector.shape_cast %80 : vector<1x8x576xf32> to vector<8x576xf32>
    %82 = vector.shape_cast %73 : vector<8x576xf32> to vector<1x8x576xf32>
    tpu.vector_store %arg6[%c0_86, %c0_87, %c0_88], %82 {strides = array<i32>} : memref<1x8x576xf32, #tpu.memory_space<vmem>>, vector<1x8x576xf32>,
    return
  }
  func.func @transform_0(%arg0: i32) -> (i32, i32, i32) {
    %c0_i32 = arith.constant 0 : i32
    %c0_i32_0 = arith.constant 0 : i32
    %c0_i32_1 = arith.constant 0 : i32
    return %arg0, %c0_i32, %c0_i32_0 : i32, i32, i32
  }
  func.func @transform_1(%arg0: i32) -> (i32, i32) {
    %c0_i32 = arith.constant 0 : i32
    %c0_i32_0 = arith.constant 0 : i32
    %c0_i32_1 = arith.constant 0 : i32
    return %c0_i32, %c0_i32_0 : i32, i32
  }
  func.func @transform_2(%arg0: i32) -> (i32, i32) {
    %c0_i32 = arith.constant 0 : i32
    %c0_i32_0 = arith.constant 0 : i32
    %c0_i32_1 = arith.constant 0 : i32
    return %c0_i32, %c0_i32_0 : i32, i32
  }
  func.func @transform_3(%arg0: i32) -> (i32, i32, i32) {
    %c0_i32 = arith.constant 0 : i32
    %c0_i32_0 = arith.constant 0 : i32
    %c0_i32_1 = arith.constant 0 : i32
    return %arg0, %c0_i32, %c0_i32_0 : i32, i32, i32
  }
  func.func @transform_4(%arg0: i32) -> (i32, i32, i32) {
    %c0_i32 = arith.constant 0 : i32
    %c0_i32_0 = arith.constant 0 : i32
    %c0_i32_1 = arith.constant 0 : i32
    return %arg0, %c0_i32, %c0_i32_0 : i32, i32, i32
  }
  func.func @transform_5(%arg0: i32) -> (i32, i32, i32) {
    %c0_i32 = arith.constant 0 : i32
    %c0_i32_0 = arith.constant 0 : i32
    %c0_i32_1 = arith.constant 0 : i32
    return %arg0, %c0_i32, %c0_i32_0 : i32, i32, i32
  }
}

</mosaic_0001>

<bundles_post_ra>
// kernel: convlstm_cell_forward.1
= control target key start
LH: loop header
LB: loop body
LE: loop exit
PB: predicated region body
PF: predicated region fallthrough
CT: control target
= control target key end

     0   :  { %s1693_s18 = smov 0   ;;  %s2006_s0 = inlined_call_operand.vmem [shape: bf16[4,16,326], index: 0, kind: input, shape index: {}]   ;;  %s2007_s1 = inlined_call_operand.vmem [shape: bf16[32,144], index: 1, kind: input, shape index: {}]   ;;  %s2008_s2 = inlined_call_operand.vmem [shape: f32[32,1], index: 2, kind: input, shape index: {}]   ;;  %s2009_s3 = inlined_call_operand.vmem [shape: f32[2,8,576], index: 3, kind: input, shape index: {}, may-alias: {3,5}]   ;;  %s2010_s4 = inlined_call_operand.vmem [shape: f32[2,8,576], index: 4, kind: output, shape index: {0}]   ;;  %s2011_s5 = inlined_call_operand.vmem [shape: f32[2,8,576], index: 5, kind: output, shape index: {1}, may-alias: {3,5}]  }
   0x1 LB: > { %s1699_s19 = sadd.s32 4294967295, %s1643_s18   ;;  %p1352_p0 = scmp.ge.s32.totalorder %s1643_s18, 1  ;;  %s1643_s18 = sphi %s1693_s18, %s16_s18  }
   0x2   : > { %p202_p1 = scmp.lt.s32.totalorder %s1643_s18, 3 }
   0x4   : > { %p203_p2 = pnand %p1352_p0, %p202_p1 }
   0x5   : > { %s1353_s20 = sshll.u32 (!%p203_p2), %s1699_s19, 1  ;;  %s1645_s25 = smov (!%p203_p2), 32   ;;  %vm286_vm0 = vcmask (!%p203_p2), 261120   ;;  %v1780_v15 = vld [vmem:[%s2007_s1 + $0x4] ss:$8 sps:$4 sm:$0xff] (!%p203_p2)   ;;  %vm926_vm1 = vcmask (!%p203_p2), 130048  }
   0x6   : > { %206 = sbr.rel (%p203_p2) target bundleno = 521 (0x209), region = 36  ;;  %p242_p3 = scmp.lt.s32.totalorder (!%p203_p2), %s1353_s20, 3  ;;  %1452 = vmatprep.mubr.msk.bf16.mxu0 (!%p203_p2), %vm926_vm1, %v1780_v15  ;;  %1454 = vmatprep.mubr.msk.bf16.mxu1 (!%p203_p2), %vm926_vm1, %v1780_v15  ;;  %v1662_v17 = vmov (!%p203_p2), 0   ;;  %vm574_vm2 = vcmask (!%p203_p2), 1047808   ;;  %vm311_vm3 = vcmask (!%p203_p2), 1039360   ;;  %vm602_vm4 = vcmask (!%p203_p2), 252928  }
   0x7   : > { %s1646_s26 = smov (!%p203_p2), 127   ;;  %s1647_s27 = smov (!%p203_p2), 31   ;;  %1527 = vset.pattern.permute.xlu0 (!%p203_p2), %v1662_v17  ;;  %1526 = vset.pattern.permute.xlu1 (!%p203_p2), %v1662_v17  ;;  %v884_v32 = vld [vmem:[%s2008_s2] sm:$0xff] (!%p203_p2)  ;;  %v885_v33 = vld [vmem:[%s2008_s2 + $0x8] sm:$0xff] (!%p203_p2)  ;;  %v887_v36 = vld [vmem:[%s2008_s2 + $0x18] sm:$0xff] (!%p203_p2)  ;;  %vm343_vm5 = vcmask (!%p203_p2), 1031168  }
   0x8   : > { %s1648_s28 = smov (!%p203_p2), 126   ;;  %s1649_s29 = smov (!%p203_p2), 30   ;;  %v886_v40 = vld [vmem:[%s2008_s2 + $0x10] sm:$0xff] (!%p203_p2)  ;;  %vm634_vm6 = vcmask (!%p203_p2), 244736   ;;  %vm375_vm7 = vcmask (!%p203_p2), 900096   ;;  %vm666_vm8 = vcmask (!%p203_p2), 113664  }
   0x9   : > { %s1650_s30 = smov (!%p203_p2), 110   ;;  %s1651_s6 = smov (!%p203_p2), 14   ;;  %vm407_vm9 = vcmask (!%p203_p2), 891904   ;;  %vm698_vm10 = vcmask (!%p203_p2), 105472   ;;  %vm439_vm11 = vcmask (!%p203_p2), 883712   ;;  %vm730_vm12 = vcmask (!%p203_p2), 97280  }
   0xa   : > { %s1652_s7 = smov (!%p203_p2), 109   ;;  %s1653_s8 = smov (!%p203_p2), 13   ;;  %vm471_vm13 = vcmask (!%p203_p2), 752640   ;;  %vm577_vm14 = vcmask (!%p203_p2), 523264   ;;  %vm762_vm15 = vcmask (!%p203_p2), 1014784  }
   0xb   : > { %s1654_s9 = smov (!%p203_p2), 108   ;;  %s1655_s10 = smov (!%p203_p2), 12  }
   0xc   : > { %s1656_s11 = smov (!%p203_p2), 92   ;;  %s1657_s12 = smov (!%p203_p2), 124  }
   0xd   : > { %s2013_s20 = smov (!%p242_p3, %s1353_s20), 3  ;;  %s1658_s13 = smov 91  }
   0xe   : > { %s1498_s21 = smul.u32 24, %s2013_s20  ;;  %s1659_s14 = smov 123  }
   0xf   : > { %s1660_s17 = smov 90   ;;  %s1661_s20 = smov 122  }
  0x10   : > { %s1707_s24 = scalar_lea.vmem %s2006_s0, %s1498_s21  ;;  %p248_p4 = scmp.lt.s32.totalorder %s1699_s19, 1 }
  0x11   : > { %v1710_v0 = vld [vmem:[%s1707_s24 + $0x18] ss:$12 sps:$4 sm:$0xff]   ;;  %v1713_v1 = vld [vmem:[%s1707_s24 + $0x1c] ss:$12 sps:$4 sm:$0xff]   ;;  %v1721_v3 = vld [vmem:[%s1707_s24] ss:$12 sps:$4 sm:$0xff]  }
  0x12   : > { %562 = vrot.lane.b32.xlu0 %v1710_v0, %s1645_s25  ;;  %v1718_v2 = vld [vmem:[%s1707_s24 + $0x4] ss:$12 sps:$4 sm:$0xff]   ;;  %v1534_v4 = vld [vmem:[%s1707_s24 + $0x8] ss:$12 sps:$4 sm:$0xff]   ;;  %v1540_v11 = vld [vmem:[%s1707_s24 + $0x20] ss:$12 sps:$4 sm:$0xff]  }
  0x13   : > { %307 = vrot.lane.b32.xlu1 %v1718_v2, %s1646_s26  ;;  %933 = vmatprep.subr.bf16.mxu0 %v1718_v2  ;;  %v1535_v5 = vld [vmem:[%s1707_s24 + $0x8] ss:$12 sps:$4 sm:$0xff]   ;;  %v1542_v13 = vld [vmem:[%s1707_s24 + $0x20] ss:$12 sps:$4 sm:$0xff]   ;;  %s2015_s19 = smov (!%p248_p4, %s1699_s19), 1 }
  0x14   : > { %934 = vmatpush1.bf16.msra.mxu0 %v1721_v3  ;;  %v1551_v6 = vld [vmem:[%s1707_s24 + $0x8] ss:$12 sps:$4 sm:$0xff]   ;;  %v1544_v16 = vld [vmem:[%s1707_s24 + $0x20] ss:$12 sps:$4 sm:$0xff]  }
  0x15   : > { %287 = vst.msk [vmem:[#allocation2 + $0x10] sm:$0xff] %vm286_vm0, %v1551_v6  ;;  %v1536_v7 = vld [vmem:[%s1707_s24 + $0x8] ss:$12 sps:$4 sm:$0xff]   ;;  %v1545_v18 = vld [vmem:[%s1707_s24 + $0x20] ss:$12 sps:$4 sm:$0xff]  }
  0x16   : > { %564 = vrot.lane.b32.xlu0 %v1713_v1, %s1645_s25  ;;  %v1537_v8 = vld [vmem:[%s1707_s24 + $0x8] ss:$12 sps:$4 sm:$0xff]   ;;  %v1547_v19 = vld [vmem:[%s1707_s24 + $0x20] ss:$12 sps:$4 sm:$0xff]  }
  0x17   : > { %309 = vrot.lane.b32.xlu1 %v1534_v4, %s1646_s26  ;;  %v1538_v9 = vld [vmem:[%s1707_s24 + $0x8] ss:$12 sps:$4 sm:$0xff]   ;;  %v1546_v20 = vld [vmem:[%s1707_s24 + $0x20] ss:$12 sps:$4 sm:$0xff]  }
  0x18   : > { %v1539_v10 = vld [vmem:[%s1707_s24 + $0x8] ss:$12 sps:$4 sm:$0xff]   ;;  %v1549_v21 = vld [vmem:[%s1707_s24 + $0x20] ss:$12 sps:$4 sm:$0xff]  }
  0x19   : > { %v1541_v12 = vld [vmem:[%s1707_s24 + $0x8] ss:$12 sps:$4 sm:$0xff]   ;;  %v1548_v22 = vld [vmem:[%s1707_s24 + $0x20] ss:$12 sps:$4 sm:$0xff]  }
  0x1a   : > { %596 = vrot.lane.b32.xlu0 %v1710_v0, %s1647_s27  ;;  %v1543_v14 = vld [vmem:[%s1707_s24 + $0x8] ss:$12 sps:$4 sm:$0xff]   ;;  %v1550_v23 = vld [vmem:[%s1707_s24 + $0x20] ss:$12 sps:$4 sm:$0xff]  }
  0x1b   : > { %598 = vrot.lane.b32.xlu1 %v1713_v1, %s1647_s27 }
  0x1e   : > { %305 = vrot.lane.b32.xlu0 %v1721_v3, %s1646_s26 }
  0x1f   : > { %339 = vrot.lane.b32.xlu1 %v1718_v2, %s1648_s28 }
  0x22   : > { %341 = vrot.lane.b32.xlu0 %v1535_v5, %s1648_s28 }
  0x23   : > { %628 = vrot.lane.b32.xlu1 %v1710_v0, %s1649_s29 }
  0x26   : > { %630 = vrot.lane.b32.xlu0 %v1713_v1, %s1649_s29 }
  0x27   : > { %337 = vrot.lane.b32.xlu1 %v1721_v3, %s1648_s28 }
  0x2a   : > { %371 = vrot.lane.b32.xlu0 %v1718_v2, %s1650_s30 }
  0x2b   : > { %373 = vrot.lane.b32.xlu1 %v1536_v7, %s1650_s30 }
  0x2e   : > { %660 = vrot.lane.b32.xlu0 %v1710_v0, %s1651_s6 }
  0x2f   : > { %662 = vrot.lane.b32.xlu1 %v1713_v1, %s1651_s6 }
  0x32   : > { %369 = vrot.lane.b32.xlu0 %v1721_v3, %s1650_s30 }
  0x33   : > { %403 = vrot.lane.b32.xlu1 %v1718_v2, %s1652_s7 }
  0x36   : > { %405 = vrot.lane.b32.xlu0 %v1537_v8, %s1652_s7 }
  0x37   : > { %692 = vrot.lane.b32.xlu1 %v1710_v0, %s1653_s8 }
  0x3a   : > { %694 = vrot.lane.b32.xlu0 %v1713_v1, %s1653_s8 }
  0x3b   : > { %401 = vrot.lane.b32.xlu1 %v1721_v3, %s1652_s7 }
  0x3e   : > { %435 = vrot.lane.b32.xlu0 %v1718_v2, %s1654_s9 }
  0x3f   : > { %437 = vrot.lane.b32.xlu1 %v1538_v9, %s1654_s9 }
  0x42   : > { %724 = vrot.lane.b32.xlu0 %v1710_v0, %s1655_s10 }
  0x43   : > { %726 = vrot.lane.b32.xlu1 %v1713_v1, %s1655_s10 }
  0x46   : > { %433 = vrot.lane.b32.xlu0 %v1721_v3, %s1654_s9 }
  0x47   : > { %467 = vrot.lane.b32.xlu1 %v1718_v2, %s1656_s11 }
  0x4a   : > { %469 = vrot.lane.b32.xlu0 %v1539_v10, %s1656_s11 }
  0x4b   : > { %758 = vrot.lane.b32.xlu1 %v1713_v1, %s1657_s12 }
  0x4e   : > { %760 = vrot.lane.b32.xlu0 %v1540_v11, %s1657_s12 }
  0x4f   : > { %465 = vrot.lane.b32.xlu1 %v1721_v3, %s1656_s11 }
  0x52   : > { %756 = vrot.lane.b32.xlu0 %v1710_v0, %s1657_s12  ;;  %s1962_s12 = smul.u32 40, %s2015_s19 }
  0x53   : > { %499 = vrot.lane.b32.xlu1 %v1718_v2, %s1658_s13 }
  0x54   : > { %s1968_s19 = scalar_lea.vmem %s2009_s3, %s1962_s12  ;;  %s1990_s22 = scalar_lea.vmem %s2010_s4, %s1962_s12 }
  0x56   : > { %501 = vrot.lane.b32.xlu0 %v1541_v12, %s1658_s13 }
  0x57   : > { %790 = vrot.lane.b32.xlu1 %v1713_v1, %s1659_s14 }
  0x5a   : > { %792 = vrot.lane.b32.xlu0 %v1542_v13, %s1659_s14 }
  0x5b   : > { %497 = vrot.lane.b32.xlu1 %v1721_v3, %s1658_s13 }
  0x5e   : > { %788 = vrot.lane.b32.xlu0 %v1710_v0, %s1659_s14 }
  0x5f   : > { %531 = vrot.lane.b32.xlu1 %v1718_v2, %s1660_s17 }
  0x62   : > { %533 = vrot.lane.b32.xlu0 %v1543_v14, %s1660_s17 }
  0x63   : > { %822 = vrot.lane.b32.xlu1 %v1713_v1, %s1661_s20 }
  0x66   : > { %824 = vrot.lane.b32.xlu0 %v1544_v16, %s1661_s20 }
  0x67   : > { %529 = vrot.lane.b32.xlu1 %v1721_v3, %s1660_s17  ;;  %s1980_s17 = scalar_lea.vmem %s2011_s5, %s1962_s12 }
  0x6a   : > { %820 = vrot.lane.b32.xlu0 %v1710_v0, %s1661_s20 }
  0x6b   : > { %566 = vrot.lane.b32.xlu1 %v1545_v18, %s1645_s25 }
  0x6e   : > { %600 = vrot.lane.b32.xlu0 %v1547_v19, %s1647_s27 }
  0x6f   : > { %632 = vrot.lane.b32.xlu1 %v1546_v20, %s1649_s29 }
  0x72   : > { %664 = vrot.lane.b32.xlu0 %v1549_v21, %s1651_s6 }
  0x73   : > { %696 = vrot.lane.b32.xlu1 %v1548_v22, %s1653_s8 }
  0x76   : > { %728 = vrot.lane.b32.xlu0 %v1550_v23, %s1655_s10 }
  0x77   : > { %890 = vperm.xlu1 %1526, %v884_v32  }
  0x7a   : > { %895 = vperm.xlu0 %1527, %v885_v33  }
  0x7b   : > { %905 = vperm.xlu1 %1526, %v887_v36  }
  0x7f   : > { %900 = vperm.xlu1 %1526, %v886_v40  }
  0x84   : > { %v563_v24 = vpop.permute.xlu0 %562 }
  0x85   : > { %575 = vst.msk [vmem:[#allocation2 + $0x10] sm:$0xff] %vm574_vm2, %v563_v24  ;;  %v308_v25 = vpop.permute.xlu1 %307 }
  0x88   : > { %v1806_v26 = vpop.permute.xlu0 %564 }
  0x89   : > { %v569_v27 = vsel %vm286_vm0, %v563_v24, %v1806_v26  ;;  %v310_v28 = vpop.permute.xlu1 %309 }
  0x8a   : > { %986 = vmatprep.subr.bf16.mxu1 %v569_v27  ;;  %v313_v29 = vsel %vm311_vm3, %v308_v25, %v310_v28  ;;  %319 = vst.msk [vmem:[#allocation2 + $0x38] sm:$0xff] %vm286_vm0, %v310_v28 }
  0x8b   : > { %935 = vmatprep.subr.bf16.mxu0 %v313_v29 }
  0x8c   : > { %v597_v30 = vpop.permute.xlu0 %596  ;;  %v841_v31 = vld [vmem:[#allocation2 + $0x10] sm:$0xff] }
  0x8d   : > { %608 = vst.msk [vmem:[#allocation2 + $0x38] sm:$0xff] %vm574_vm2, %v597_v30  ;;  %987 = vmatpush1.bf16.msra.mxu1 %v841_v31  ;;  %v1819_v34 = vpop.permute.xlu1 %598 }
  0x8e   : > { %v603_v35 = vsel %vm602_vm4, %v597_v30, %v1819_v34 }
  0x8f   : > { %988 = vmatprep.subr.bf16.mxu1 %v603_v35 }
  0x90   : > { %v306_v37 = vpop.permute.xlu0 %305 }
  0x91   : > { %v312_v38 = vsel %vm311_vm3, %v306_v37, %v308_v25  ;;  %v340_v39 = vpop.permute.xlu1 %339  ;;  %vm503_vm3 = vcmask 744448  }
  0x92   : > { %936 = vmatpush1.bf16.msra.mxu0 %v312_v38 }
  0x94   : > { %v342_v41 = vpop.permute.xlu0 %341  ;;  %v846_v42 = vld [vmem:[#allocation2 + $0x38] sm:$0xff] }
  0x95   : > { %v345_v43 = vsel %vm343_vm5, %v340_v39, %v342_v41  ;;  %351 = vst.msk [vmem:[#allocation2 + $0x60] sm:$0xff] %vm286_vm0, %v342_v41  ;;  %989 = vmatpush1.bf16.msra.mxu1 %v846_v42  ;;  %v629_v44 = vpop.permute.xlu1 %628 }
  0x96   : > { %937 = vmatprep.subr.bf16.mxu0 %v345_v43  ;;  %640 = vst.msk [vmem:[#allocation2 + $0x60] sm:$0xff] %vm574_vm2, %v629_v44  ;;  %v835_v43 = vld [vmem:[%s2007_s1] sm:$0xff] }
  0x98   : > { %v1833_v45 = vpop.permute.xlu0 %630 }
  0x99   : > { %v635_v46 = vsel %vm634_vm6, %v629_v44, %v1833_v45  ;;  %v338_v47 = vpop.permute.xlu1 %337  ;;  %v836_v44 = vld [vmem:[%s2007_s1 + $0x8] sm:$0xff] }
  0x9a   : > { %990 = vmatprep.subr.bf16.mxu1 %v635_v46  ;;  %v344_v48 = vsel %vm343_vm5, %v338_v47, %v340_v39  ;;  %vm794_vm5 = vcmask 1006592  }
  0x9b   : > { %938 = vmatpush1.bf16.msra.mxu0 %v344_v48 }
  0x9c   : > { %v372_v49 = vpop.permute.xlu0 %371 }
  0x9d   : > { %v374_v50 = vpop.permute.xlu1 %373  ;;  %v851_v51 = vld [vmem:[#allocation2 + $0x60] sm:$0xff] }
  0x9e   : > { %383 = vst.msk [vmem:[#allocation2 + $0x88] sm:$0xff] %vm286_vm0, %v374_v50  ;;  %v377_v52 = vsel %vm375_vm7, %v372_v49, %v374_v50  ;;  %991 = vmatpush1.bf16.msra.mxu1 %v851_v51  ;;  %v1877_v50 = vcombine.low %v835_v43, %v836_v44 }
  0x9f   : > { %939 = vmatprep.subr.bf16.mxu0 %v377_v52  ;;  %v1554_v52 = vld [vmem:[%s2007_s1 + $0x14] ss:$8 sps:$4 sm:$0xff]  }
  0xa0   : > { %v661_v53 = vpop.permute.xlu0 %660 }
  0xa1   : > { %672 = vst.msk [vmem:[#allocation2 + $0x88] sm:$0xff] %vm574_vm2, %v661_v53  ;;  %v1841_v54 = vpop.permute.xlu1 %662 }
  0xa2   : > { %v667_v55 = vsel %vm666_vm8, %v661_v53, %v1841_v54 }
  0xa3   : > { %992 = vmatprep.subr.bf16.mxu1 %v667_v55 }
  0xa4   : > { %v370_v56 = vpop.permute.xlu0 %369 }
  0xa5   : > { %v376_v57 = vsel %vm375_vm7, %v370_v56, %v372_v49  ;;  %v404_v58 = vpop.permute.xlu1 %403  ;;  %vm535_vm7 = vcmask 736256  }
  0xa6   : > { %940 = vmatpush1.bf16.msra.mxu0 %v376_v57 }
  0xa8   : > { %v406_v59 = vpop.permute.xlu0 %405  ;;  %v856_v60 = vld [vmem:[#allocation2 + $0x88] sm:$0xff] }
  0xa9   : > { %v409_v61 = vsel %vm407_vm9, %v404_v58, %v406_v59  ;;  %415 = vst.msk [vmem:[#allocation2 + $0xb0] sm:$0xff] %vm286_vm0, %v406_v59  ;;  %993 = vmatpush1.bf16.msra.mxu1 %v856_v60  ;;  %v693_v62 = vpop.permute.xlu1 %692 }
  0xaa   : > { %941 = vmatprep.subr.bf16.mxu0 %v409_v61  ;;  %704 = vst.msk [vmem:[#allocation2 + $0xb0] sm:$0xff] %vm574_vm2, %v693_v62 }
  0xac   : > { %v1848_v63 = vpop.permute.xlu0 %694 }
  0xad   : > { %v699_v0 = vsel %vm698_vm10, %v693_v62, %v1848_v63  ;;  %v402_v1 = vpop.permute.xlu1 %401 }
  0xae   : > { %994 = vmatprep.subr.bf16.mxu1 %v699_v0  ;;  %v408_v2 = vsel %vm407_vm9, %v402_v1, %v404_v58  ;;  %vm826_vm9 = vcmask 998400  }
  0xaf   : > { %942 = vmatpush1.bf16.msra.mxu0 %v408_v2 }
  0xb0   : > { %v436_v3 = vpop.permute.xlu0 %435 }
  0xb1   : > { %v438_v4 = vpop.permute.xlu1 %437  ;;  %v861_v5 = vld [vmem:[#allocation2 + $0xb0] sm:$0xff] }
  0xb2   : > { %447 = vst.msk [vmem:[#allocation2 + $0xd8] sm:$0xff] %vm286_vm0, %v438_v4  ;;  %v441_v6 = vsel %vm439_vm11, %v436_v3, %v438_v4  ;;  %995 = vmatpush1.bf16.msra.mxu1 %v861_v5 }
  0xb3   : > { %943 = vmatprep.subr.bf16.mxu0 %v441_v6 }
  0xb4   : > { %v725_v7 = vpop.permute.xlu0 %724 }
  0xb5   : > { %736 = vst.msk [vmem:[#allocation2 + $0xd8] sm:$0xff] %vm574_vm2, %v725_v7  ;;  %v1855_v8 = vpop.permute.xlu1 %726 }
  0xb6   : > { %v731_v9 = vsel %vm730_vm12, %v725_v7, %v1855_v8 }
  0xb7   : > { %996 = vmatprep.subr.bf16.mxu1 %v731_v9 }
  0xb8   : > { %v434_v10 = vpop.permute.xlu0 %433 }
  0xb9   : > { %v440_v11 = vsel %vm439_vm11, %v434_v10, %v436_v3  ;;  %v468_v12 = vpop.permute.xlu1 %467 }
  0xba   : > { %944 = vmatpush1.bf16.msra.mxu0 %v440_v11 }
  0xbc   : > { %v470_v13 = vpop.permute.xlu0 %469  ;;  %v866_v14 = vld [vmem:[#allocation2 + $0xd8] sm:$0xff] }
  0xbd   : > { %v473_v16 = vsel %vm471_vm13, %v468_v12, %v470_v13  ;;  %479 = vst.msk [vmem:[#allocation2 + $0x100] sm:$0xff] %vm286_vm0, %v470_v13  ;;  %997 = vmatpush1.bf16.msra.mxu1 %v866_v14  ;;  %v759_v18 = vpop.permute.xlu1 %758 }
  0xbe   : > { %945 = vmatprep.subr.bf16.mxu0 %v473_v16 }
  0xc0   : > { %v761_v19 = vpop.permute.xlu0 %760 }
  0xc1   : > { %v764_v20 = vsel %vm762_vm15, %v759_v18, %v761_v19  ;;  %770 = vst.msk [vmem:[#allocation2 + $0x110] sm:$0xff] %vm577_vm14, %v761_v19  ;;  %v466_v21 = vpop.permute.xlu1 %465 }
  0xc2   : > { %998 = vmatprep.subr.bf16.mxu1 %v764_v20  ;;  %v472_v22 = vsel %vm471_vm13, %v466_v21, %v468_v12 }
  0xc3   : > { %946 = vmatpush1.bf16.msra.mxu0 %v472_v22 }
  0xc4   : > { %v757_v23 = vpop.permute.xlu0 %756 }
  0xc5   : > { %v763_v24 = vsel %vm762_vm15, %v757_v23, %v759_v18  ;;  %v500_v25 = vpop.permute.xlu1 %499 }
  0xc6   : > { %768 = vst.msk [vmem:[#allocation2 + $0x100] sm:$0xff] %vm574_vm2, %v763_v24 }
  0xc8   : > { %v502_v27 = vpop.permute.xlu0 %501  ;;  %v873_v6 = vld [vmem:[#allocation2 + $0x110] sm:$0xff] }
  0xc9   : > { %v505_v28 = vsel %vm503_vm3, %v500_v25, %v502_v27  ;;  %511 = vst.msk [vmem:[#allocation2 + $0x128] sm:$0xff] %vm286_vm0, %v502_v27  ;;  %v791_v29 = vpop.permute.xlu1 %790 }
  0xca   : > { %947 = vmatprep.subr.bf16.mxu0 %v505_v28 }
  0xcc   : > { %v793_v30 = vpop.permute.xlu0 %792 }
  0xcd   : > { %v796_v31 = vsel %vm794_vm5, %v791_v29, %v793_v30  ;;  %802 = vst.msk [vmem:[#allocation2 + $0x138] sm:$0xff] %vm577_vm14, %v793_v30  ;;  %v871_v32 = vld [vmem:[#allocation2 + $0x100] sm:$0xff]  ;;  %v498_v33 = vpop.permute.xlu1 %497 }
  0xce   : > { %999 = vmatpush1.bf16.msra.mxu1 %v871_v32  ;;  %v504_v35 = vsel %vm503_vm3, %v498_v33, %v500_v25 }
  0xcf   : > { %1000 = vmatprep.subr.bf16.mxu1 %v796_v31  ;;  %948 = vmatpush1.bf16.msra.mxu0 %v504_v35 }
  0xd0   : > { %v789_v36 = vpop.permute.xlu0 %788 }
  0xd1   : > { %v795_v37 = vsel %vm794_vm5, %v789_v36, %v791_v29  ;;  %v532_v38 = vpop.permute.xlu1 %531 }
  0xd2   : > { %800 = vst.msk [vmem:[#allocation2 + $0x128] sm:$0xff] %vm574_vm2, %v795_v37 }
  0xd4   : > { %v534_v39 = vpop.permute.xlu0 %533  ;;  %v878_v7 = vld [vmem:[#allocation2 + $0x138] sm:$0xff] }
  0xd5   : > { %v537_v40 = vsel %vm535_vm7, %v532_v38, %v534_v39  ;;  %543 = vst.msk [vmem:[#allocation2 + $0x150] sm:$0xff] %vm286_vm0, %v534_v39  ;;  %v823_v41 = vpop.permute.xlu1 %822 }
  0xd6   : > { %949 = vmatprep.subr.bf16.mxu0 %v537_v40 }
  0xd8   : > { %v825_v42 = vpop.permute.xlu0 %824 }
  0xd9   : > { %v828_v46 = vsel %vm826_vm9, %v823_v41, %v825_v42  ;;  %834 = vst.msk [vmem:[#allocation2 + $0x160] sm:$0xff] %vm577_vm14, %v825_v42  ;;  %v876_v47 = vld [vmem:[#allocation2 + $0x128] sm:$0xff]  ;;  %v530_v48 = vpop.permute.xlu1 %529 }
  0xda   : > { %1001 = vmatpush1.bf16.msra.mxu1 %v876_v47  ;;  %v536_v49 = vsel %vm535_vm7, %v530_v48, %v532_v38 }
  0xdb   : > { %1002 = vmatprep.subr.bf16.mxu1 %v828_v46  ;;  %950 = vmatpush1.bf16.msra.mxu0 %v536_v49 }
  0xdc   : > { %v821_v51 = vpop.permute.xlu0 %820  ;;  %1039 = vmatprep.subr.bf16.mxu0 %v1662_v17 }
  0xdd   : > { %v827_v53 = vsel %vm826_vm9, %v821_v51, %v823_v41  ;;  %v567_v55 = vpop.permute.xlu1 %566 }
  0xde   : > { %832 = vst.msk [vmem:[#allocation2 + $0x150] sm:$0xff] %vm574_vm2, %v827_v53  ;;  %v570_v56 = vsel %vm286_vm0, %v1806_v26, %v567_v55  ;;  %966 = vmatmul.mubr.bf16.vlgmr.msra.gmra.mrb[0].mxu0 %v1877_v50  ;;  %v1898_v26 = vld [vmem:[%s2007_s1 + $0x10] ss:$8 sps:$4 sm:$0xff]  }
  0xdf   : > { %578 = vst.msk [vmem:[#allocation2 + $0x20] sm:$0xff] %vm577_vm14, %v570_v56  ;;  %1453 = vmatprep.mubr.msk.bf16.mxu0 %vm926_vm1, %v1554_v52 }
  0xe0   : > { %v601_v57 = vpop.permute.xlu0 %600 }
  0xe1   : > { %v604_v58 = vsel %vm602_vm4, %v1819_v34, %v601_v57  ;;  %v633_v59 = vpop.permute.xlu1 %632 }
  0xe2   : > { %610 = vst.msk [vmem:[#allocation2 + $0x48] sm:$0xff] %vm577_vm14, %v604_v58  ;;  %v636_v60 = vsel %vm634_vm6, %v1833_v45, %v633_v59 }
  0xe3   : > { %642 = vst.msk [vmem:[#allocation2 + $0x70] sm:$0xff] %vm577_vm14, %v636_v60 }
  0xe4   : > { %v665_v61 = vpop.permute.xlu0 %664 }
  0xe5   : > { %v668_v62 = vsel %vm666_vm8, %v1841_v54, %v665_v61  ;;  %v881_v0 = vld [vmem:[#allocation2 + $0x150] sm:$0xff]  ;;  %v697_v1 = vpop.permute.xlu1 %696 }
  0xe6   : > { %674 = vst.msk [vmem:[#allocation2 + $0x98] sm:$0xff] %vm577_vm14, %v668_v62  ;;  %1003 = vmatpush1.bf16.msra.mxu1 %v881_v0  ;;  %v700_v34 = vsel %vm698_vm10, %v1848_v63, %v697_v1  ;;  %v843_v45 = vld [vmem:[#allocation2 + $0x20] sm:$0xff]  ;;  %976 = vmatmul.mubr.bf16.gmra.mrb[4].mxu0 %v1898_v26 }
  0xe7   : > { %1480 = vmatprep.subr.bf16.mxu1 %v1662_v17  ;;  %706 = vst.msk [vmem:[#allocation2 + $0xc0] sm:$0xff] %vm577_vm14, %v700_v34  ;;  %1040 = vmatpush1.bf16.msra.mxu0 %v843_v45 }
  0xe8   : > { %v729_v2 = vpop.permute.xlu0 %728  ;;  %1456 = vmatprep.mubr.msk.bf16.mxu0 %vm926_vm1, %v1780_v15  ;;  %1041 = vmatprep.subr.bf16.mxu0 %v1662_v17 }
  0xe9   : > { %v732_v54 = vsel %vm730_vm12, %v1855_v8, %v729_v2  ;;  %1019 = vmatmul.mubr.bf16.vlgmr.msra.gmra.mrb[0].mxu1 %v1877_v50  ;;  %v848_v63 = vld [vmem:[#allocation2 + $0x48] sm:$0xff]  ;;  %v883_v8 = vld [vmem:[#allocation2 + $0x160] sm:$0xff] }
  0xea   : > { %738 = vst.msk [vmem:[#allocation2 + $0xe8] sm:$0xff] %vm577_vm14, %v732_v54  ;;  %1489 = vmatpush1.bf16.msra.mxu1 %v843_v45  ;;  %1455 = vmatprep.mubr.msk.bf16.mxu1 %vm926_vm1, %v1554_v52  ;;  %v853_v15 = vld [vmem:[#allocation2 + $0x70] sm:$0xff] }
  0xeb   : > { %1481 = vmatprep.subr.bf16.mxu1 %v1662_v17  ;;  %1042 = vmatpush1.bf16.msra.mxu0 %v848_v63 }
  0xec   : > { %1043 = vmatprep.subr.bf16.mxu0 %v1662_v17 }
  0xed   : > { %v858_v3 = vld [vmem:[#allocation2 + $0x98] sm:$0xff] }
  0xee   : > { %1490 = vmatpush1.bf16.msra.mxu1 %v848_v63  ;;  %v863_v4 = vld [vmem:[#allocation2 + $0xc0] sm:$0xff] }
  0xef   : > { %1482 = vmatprep.subr.bf16.mxu1 %v1662_v17  ;;  %1044 = vmatpush1.bf16.msra.mxu0 %v853_v15 }
  0xf0   : > { %1045 = vmatprep.subr.bf16.mxu0 %v1662_v17 }
  0xf1   : > { %1029 = vmatmul.mubr.bf16.gmra.mrb[4].mxu1 %v1898_v26  ;;  %v868_v5 = vld [vmem:[#allocation2 + $0xe8] sm:$0xff] }
  0xf2   : > { %1491 = vmatpush1.bf16.msra.mxu1 %v853_v15  ;;  %1457 = vmatprep.mubr.msk.bf16.mxu1 %vm926_vm1, %v1554_v52 }
  0xf3   : > { %1483 = vmatprep.subr.bf16.mxu1 %v1662_v17  ;;  %1046 = vmatpush1.bf16.msra.mxu0 %v858_v3 }
  0xf4   : > { %1047 = vmatprep.subr.bf16.mxu0 %v1662_v17 }
  0xf6   : > { %1492 = vmatpush1.bf16.msra.mxu1 %v858_v3  ;;  %v1936_v9 = vpop.permute.xlu1 %890 }
  0xf7   : > { %1484 = vmatprep.subr.bf16.mxu1 %v1662_v17  ;;  %1048 = vmatpush1.bf16.msra.mxu0 %v863_v4 }
  0xf8   : > { %1049 = vmatprep.subr.bf16.mxu0 %v1662_v17 }
  0xf9   : > { %v1939_v13 = vpop.permute.xlu0 %895 }
  0xfa   : > { %1493 = vmatpush1.bf16.msra.mxu1 %v863_v4  ;;  %v1943_v20 = vpop.permute.xlu1 %905 }
  0xfb   : > { %1485 = vmatprep.subr.bf16.mxu1 %v1662_v17  ;;  %1050 = vmatpush1.bf16.msra.mxu0 %v868_v5 }
  0xfc   : > { %1051 = vmatprep.subr.bf16.mxu0 %v1662_v17 }
  0xfe   : > { %1494 = vmatpush1.bf16.msra.mxu1 %v868_v5  ;;  %v1946_v25 = vpop.permute.xlu1 %900 }
  0xff   : > { %1486 = vmatprep.subr.bf16.mxu1 %v1662_v17  ;;  %1052 = vmatpush1.bf16.msra.mxu0 %v873_v6 }
 0x100   : > { %1053 = vmatprep.subr.bf16.mxu0 %v1662_v17 }
 0x102   : > { %1495 = vmatpush1.bf16.msra.mxu1 %v873_v6 }
 0x103   : > { %1487 = vmatprep.subr.bf16.mxu1 %v1662_v17  ;;  %1054 = vmatpush1.bf16.msra.mxu0 %v878_v7 }
 0x104   : > { %1055 = vmatprep.subr.bf16.mxu0 %v1662_v17 }
 0x106   : > { %1496 = vmatpush1.bf16.msra.mxu1 %v878_v7 }
 0x107   : > { %1488 = vmatprep.subr.bf16.mxu1 %v1662_v17  ;;  %1056 = vmatpush1.bf16.msra.mxu0 %v883_v8 }
 0x10a   : > { %1497 = vmatpush1.bf16.msra.mxu1 %v883_v8  ;;  %1072 = vmatmul.mubr.bf16.vlgmr.msra.gmra.mrb[8].mxu0 %v1877_v50 }
 0x10d   : > { %1080 = vmatmul.mubr.bf16.vlgmr.msra.gmra.mrb[8].mxu1 %v1898_v26 }
 0x1b1   : > { %v967_v10 = vpop.f32.mrb[0].mxu0 }
 0x1b2   : > { %v969_v11 = vpop.f32.mrb[1].mxu0  ;;  %v968_v12 = vadd.f32 %v967_v10, %v1936_v9 }
 0x1b3   : > { %v971_v14 = vpop.f32.mrb[2].mxu0  ;;  %v970_v16 = vadd.f32 %v969_v11, %v1936_v9 }
 0x1b4   : > { %v1458_v18 = vmul.f32 -1.442695, %v968_v12  ;;  %v973_v19 = vpop.f32.mrb[3].mxu0  ;;  %v972_v17 = vadd.f32 %v971_v14, %v1939_v13 }
 0x1b5   : > { %v974_v21 = vadd.f32 %v973_v19, %v1939_v13  ;;  %v1459_v22 = vmul.f32 -1.442695, %v970_v16 }
 0x1b6   : > { %1557 = vpow2.f32 %v1458_v18  ;;  %v1463_v23 = vmul.f32 -1.442695, %v972_v17 }
 0x1b7   : > { %v1464_v27 = vmul.f32 -1.442695, %v974_v21  ;;  %1559 = vpow2.f32 %v1459_v22 }
 0x1b8   : > { %1561 = vpow2.f32 %v1463_v23 }
 0x1b9   : > { %v977_v24 = vpop.f32.mrb[4].mxu0  ;;  %1563 = vpow2.f32 %v1464_v27 }
 0x1ba   : > { %v979_v28 = vpop.f32.mrb[5].mxu0  ;;  %v978_v35 = vadd.f32 %v977_v24, %v1946_v25 }
 0x1bb   : > { %v981_v30 = vpop.f32.mrb[6].mxu0  ;;  %v980_v38 = vadd.f32 %v979_v28, %v1946_v25 }
 0x1bc   : > { %v1020_v29 = vpop.f32.mrb[0].mxu1  ;;  %v983_v33 = vpop.f32.mrb[7].mxu0  ;;  %v982_v47 = vadd.f32 %v981_v30, %v1943_v20  ;;  %v1468_v48 = vmul.f32 -1.442695, %v978_v35 }
 0x1bd   : > { %v1021_v31 = vadd.f32 %v1020_v29, %v1936_v9  ;;  %v1022_v32 = vpop.f32.mrb[1].mxu1  ;;  %v984_v49 = vadd.f32 %v983_v33, %v1943_v20  ;;  %v1469_v50 = vmul.f32 -1.442695, %v980_v38 }
 0x1be   : > { %v1023_v36 = vadd.f32 %v1022_v32, %v1936_v9  ;;  %v1024_v37 = vpop.f32.mrb[2].mxu1  ;;  %v1473_v55 = vmul.f32 -1.442695, %v982_v47 }
 0x1bf   : > { %v1460_v39 = vmul.f32 -1.442695, %v1021_v31  ;;  %v1025_v40 = vadd.f32 %v1024_v37, %v1939_v13  ;;  %v1026_v41 = vpop.f32.mrb[3].mxu1  ;;  %v1474_v58 = vmul.f32 -1.442695, %v984_v49 }
 0x1c0   : > { %v1461_v42 = vmul.f32 -1.442695, %v1023_v36  ;;  %v1027_v43 = vadd.f32 %v1026_v41, %v1939_v13  ;;  %v1558_v44 = vpop.eup %1557 }
 0x1c1   : > { %1565 = vpow2.f32 %v1460_v39  ;;  %v1465_v46 = vmul.f32 -1.442695, %v1025_v40  ;;  %v1148_v51 = vadd.f32 1.0, %v1558_v44  ;;  %v1560_v60 = vpop.eup %1559  ;;  %v1208_v40 = vld [vmem:[%s1968_s19] sm:$0xff] }
 0x1c2   : > { %1567 = vpow2.f32 %v1461_v42  ;;  %v1466_v52 = vmul.f32 -1.442695, %v1027_v43  ;;  %v1562_v62 = vpop.eup %1561  ;;  %v1149_v54 = vadd.f32 1.0, %v1560_v60  ;;  %v1209_v43 = vld [vmem:[%s1968_s19 + $0x8] sm:$0xff] }
 0x1c3   : > { %1569 = vpow2.f32 %v1465_v46  ;;  %v1564_v1 = vpop.eup %1563  ;;  %v1153_v3 = vadd.f32 1.0, %v1562_v62 }
 0x1c4   : > { %v1030_v53 = vpop.f32.mrb[4].mxu1  ;;  %1571 = vpow2.f32 %v1468_v48  ;;  %v1154_v5 = vadd.f32 1.0, %v1564_v1  ;;  %v1210_v48 = vld [vmem:[%s1968_s19 + $0x10] sm:$0xff] }
 0x1c5   : > { %v1032_v56 = vpop.f32.mrb[5].mxu1  ;;  %v1031_v57 = vadd.f32 %v1030_v53, %v1946_v25  ;;  %1573 = vpow2.f32 %v1469_v50 }
 0x1c6   : > { %v1034_v59 = vpop.f32.mrb[6].mxu1  ;;  %1575 = vrcp.f32 %v1148_v51  ;;  %v1033_v45 = vadd.f32 %v1032_v56, %v1946_v25 }
 0x1c7   : > { %v1035_v26 = vadd.f32 %v1034_v59, %v1943_v20  ;;  %v1036_v61 = vpop.f32.mrb[7].mxu1  ;;  %1577 = vpow2.f32 %v1466_v52  ;;  %v1470_v2 = vmul.f32 -1.442695, %v1031_v57 }
 0x1c8   : > { %v1037_v0 = vadd.f32 %v1036_v61, %v1943_v20  ;;  %1579 = vpow2.f32 %v1473_v55  ;;  %v1471_v7 = vmul.f32 -1.442695, %v1033_v45 }
 0x1c9   : > { %v1475_v34 = vmul.f32 -1.442695, %v1035_v26  ;;  %1581 = vpow2.f32 %v1474_v58  ;;  %v1211_v58 = vld [vmem:[%s1968_s19 + $0x18] sm:$0xff] }
 0x1ca   : > { %v1476_v63 = vmul.f32 -1.442695, %v1037_v0 }
 0x1cb   : > { %v1566_v15 = vpop.eup %1565  ;;  %1583 = vpow2.f32 %v1475_v34  ;;  %v1212_v34 = vld [vmem:[%s1968_s19 + $0x20] sm:$0xff] }
 0x1cc   : > { %v1568_v4 = vpop.eup %1567  ;;  %1585 = vpow2.f32 %v1476_v63  ;;  %v1150_v8 = vadd.f32 1.0, %v1566_v15 }
 0x1cd   : > { %v1570_v6 = vpop.eup %1569  ;;  %1587 = vpow2.f32 %v1470_v2  ;;  %v1151_v11 = vadd.f32 1.0, %v1568_v4 }
 0x1ce   : > { %1589 = vrcp.f32 %v1149_v54  ;;  %v1572_v10 = vpop.eup %1571  ;;  %v1155_v14 = vadd.f32 1.0, %v1570_v6 }
 0x1cf   : > { %1591 = vrcp.f32 %v1153_v3  ;;  %v1574_v12 = vpop.eup %1573  ;;  %v1158_v29 = vadd.f32 1.0, %v1572_v10 }
 0x1d0   : > { %1593 = vrcp.f32 %v1154_v5  ;;  %v1576_v16 = vpop.eup %1575  ;;  %v1159_v32 = vadd.f32 1.0, %v1574_v12 }
 0x1d1   : > { %1595 = vpow2.f32 %v1471_v7  ;;  %v1578_v18 = vpop.eup %1577 }
 0x1d2   : > { %1597 = vrcp.f32 %v1150_v8  ;;  %v1580_v19 = vpop.eup %1579  ;;  %v1156_v17 = vadd.f32 1.0, %v1578_v18 }
 0x1d3   : > { %1599 = vrcp.f32 %v1151_v11  ;;  %v1582_v21 = vpop.eup %1581  ;;  %v1163_v22 = vadd.f32 1.0, %v1580_v19 }
 0x1d4   : > { %1601 = vrcp.f32 %v1155_v14  ;;  %v1164_v24 = vadd.f32 1.0, %v1582_v21 }
 0x1d5   : > { %v1584_v23 = vpop.eup %1583  ;;  %1603 = vrcp.f32 %v1156_v17 }
 0x1d6   : > { %v1586_v27 = vpop.eup %1585  ;;  %1605 = vrcp.f32 %v1163_v22  ;;  %v1165_v28 = vadd.f32 1.0, %v1584_v23 }
 0x1d7   : > { %v1588_v30 = vpop.eup %1587  ;;  %1607 = vrcp.f32 %v1164_v24  ;;  %v1166_v31 = vadd.f32 1.0, %v1586_v27 }
 0x1d8   : > { %v1590_v33 = vpop.eup %1589  ;;  %1609 = vrcp.f32 %v1165_v28  ;;  %v1160_v35 = vadd.f32 1.0, %v1588_v30 }
 0x1d9   : > { %v1592_v36 = vpop.eup %1591  ;;  %1611 = vrcp.f32 %v1166_v31 }
 0x1da   : > { %v1594_v37 = vpop.eup %1593  ;;  %1613 = vrcp.f32 %v1158_v29  ;;  %v1213_v49 = vmul.f32 %v1592_v36, %v1208_v40 }
 0x1db   : > { %v1596_v38 = vpop.eup %1595  ;;  %1615 = vrcp.f32 %v1159_v32  ;;  %v1214_v53 = vmul.f32 %v1594_v37, %v1209_v43 }
 0x1dc   : > { %v1598_v39 = vpop.eup %1597  ;;  %v1161_v41 = vadd.f32 1.0, %v1596_v38  ;;  %1617 = vrcp.f32 %v1160_v35 }
 0x1dd   : > { %v1600_v42 = vpop.eup %1599  ;;  %v1073_v46 = vpop.f32.mrb[8].mxu0 }
 0x1de   : > { %v1602_v44 = vpop.eup %1601  ;;  %1619 = vrcp.f32 %v1161_v41  ;;  %v1074_v50 = vadd.f32 %v1073_v46, %v1936_v9  ;;  %v1075_v51 = vpop.f32.mrb[9].mxu0 }
 0x1df   : > { %v1604_v47 = vpop.eup %1603  ;;  %v1076_v55 = vpop.f32.mrb[10].mxu0  ;;  %v1215_v9 = vmul.f32 %v1602_v44, %v1210_v48 }
 0x1e0   : > { %v1606_v52 = vpop.eup %1605  ;;  %v1081_v56 = vpop.f32.mrb[8].mxu1  ;;  %v1462_v60 = vmul.f32 -1.442695, %v1074_v50  ;;  %v1077_v26 = vadd.f32 %v1076_v55, %v1939_v13  ;;  %v1216_v5 = vmul.f32 %v1604_v47, %v1211_v58 }
 0x1e1   : > { %v1608_v57 = vpop.eup %1607  ;;  %v1218_v59 = vmul.f32 %v1606_v52, %v1576_v16  ;;  %v1078_v61 = vpop.f32.mrb[11].mxu0  ;;  %v1082_v45 = vadd.f32 %v1081_v56, %v1946_v25 }
 0x1e2   : > { %v1083_v62 = vpop.f32.mrb[9].mxu1  ;;  %v1610_v0 = vpop.eup %1609  ;;  %v1219_v1 = vmul.f32 %v1608_v57, %v1590_v33  ;;  %1621 = vpow2.f32 %v1462_v60  ;;  %v1467_v13 = vmul.f32 -1.442695, %v1077_v26 }
 0x1e3   : > { %v1084_v2 = vpop.f32.mrb[10].mxu1  ;;  %v1612_v54 = vpop.eup %1611  ;;  %v1223_v63 = vadd.f32 %v1218_v59, %v1213_v49  ;;  %v1220_v15 = vmul.f32 %v1610_v0, %v1598_v39  ;;  %v1472_v18 = vmul.f32 -1.442695, %v1082_v45 }
 0x1e4   : > { %v1086_v3 = vpop.f32.mrb[11].mxu1  ;;  %v1614_v4 = vpop.eup %1613  ;;  %v1224_v6 = vadd.f32 %v1219_v1, %v1214_v53  ;;  %v1221_v7 = vmul.f32 %v1612_v54, %v1600_v42  ;;  %v1085_v8 = vadd.f32 %v1084_v2, %v1943_v20  ;;  %1623 = vpow2.f32 %v1467_v13 }
 0x1e5   : > { %v1616_v10 = vpop.eup %1615  ;;  %v1228_v11 = vmax.f32 %v1223_v63, 0.0  ;;  %v1225_v25 = vadd.f32 %v1220_v15, %v1215_v9  ;;  %1243 = vst [vmem:[%s1980_s17] sm:$0xff] %v1223_v63 }
 0x1e6   : > { %v1618_v12 = vpop.eup %1617  ;;  %v1229_v14 = vmax.f32 %v1224_v6, 0.0  ;;  %v1226_v16 = vadd.f32 %v1221_v7, %v1216_v5  ;;  %1244 = vst [vmem:[%s1980_s17 + $0x8] sm:$0xff] %v1224_v6  ;;  %v1477_v20 = vmul.f32 -1.442695, %v1085_v8 }
 0x1e7   : > { %v1230_v19 = vmax.f32 %v1225_v25, 0.0  ;;  %v1233_v17 = vmul.f32 %v1614_v4, %v1228_v11  ;;  %1245 = vst [vmem:[%s1980_s17 + $0x10] sm:$0xff] %v1225_v25 }
 0x1e8   : > { %v1620_v21 = vpop.eup %1619  ;;  %v1231_v22 = vmax.f32 %v1226_v16, 0.0  ;;  %v1234_v23 = vmul.f32 %v1616_v10, %v1229_v14  ;;  %1246 = vst [vmem:[%s1980_s17 + $0x18] sm:$0xff] %v1226_v16  ;;  %1625 = vpow2.f32 %v1477_v20 }
 0x1e9   : > { %v1235_v24 = vmul.f32 %v1618_v12, %v1230_v19  ;;  %1238 = vst [vmem:[%s1990_s22] sm:$0xff] %v1233_v17  ;;  %1627 = vpow2.f32 %v1472_v18 }
 0x1ea   : > { %v1236_v27 = vmul.f32 %v1620_v21, %v1231_v22  ;;  %1239 = vst [vmem:[%s1990_s22 + $0x8] sm:$0xff] %v1234_v23 }
 0x1eb   : > { %1240 = vst [vmem:[%s1990_s22 + $0x10] sm:$0xff] %v1235_v24 }
 0x1ec   : > { %1241 = vst [vmem:[%s1990_s22 + $0x18] sm:$0xff] %v1236_v27  ;;  %v1622_v28 = vpop.eup %1621 }
 0x1ed   : > { %v1152_v30 = vadd.f32 1.0, %v1622_v28 }
 0x1ee   : > { %v1624_v29 = vpop.eup %1623 }
 0x1ef   : > { %v1157_v31 = vadd.f32 1.0, %v1624_v29 }
 0x1f1   : > { %1629 = vrcp.f32 %v1157_v31 }
 0x1f2   : > { %v1626_v32 = vpop.eup %1625  ;;  %1631 = vrcp.f32 %v1152_v30 }
 0x1f3   : > { %v1167_v33 = vadd.f32 1.0, %v1626_v32  ;;  %v1628_v35 = vpop.eup %1627 }
 0x1f4   : > { %v1162_v36 = vadd.f32 1.0, %v1628_v35 }
 0x1f5   : > { %1633 = vrcp.f32 %v1167_v33 }
 0x1f6   : > { %1635 = vrcp.f32 %v1162_v36 }
 0x1fb   : > { %v1630_v37 = vpop.eup %1629 }
 0x1fc   : > { %v1632_v38 = vpop.eup %1631  ;;  %v1217_v40 = vmul.f32 %v1630_v37, %v1212_v34 }
 0x1ff   : > { %v1634_v39 = vpop.eup %1633 }
 0x200   : > { %v1222_v41 = vmul.f32 %v1634_v39, %v1632_v38  ;;  %v1636_v44 = vpop.eup %1635 }
 0x202   : > { %v1227_v42 = vadd.f32 %v1222_v41, %v1217_v40 }
 0x204   : > { %v1232_v43 = vmax.f32 %v1227_v42, 0.0  ;;  %1247 = vst.msk [vmem:[%s1980_s17 + $0x20] sm:$0xff] %vm577_vm14, %v1227_v42 }
 0x206   : > { %v1237_v46 = vmul.f32 %v1636_v44, %v1232_v43 }
 0x208   : > { %1242 = vst.msk [vmem:[%s1990_s22 + $0x20] sm:$0xff] %vm577_vm14, %v1237_v46 }
 0x209 PF: > { %s16_s18 = sadd.s32 1, %s1643_s18  }
 0x20a   : > { %p13_p5 = scmp.ge.s32.totalorder %s16_s18, 4  }
 0x20c   :  { %15 = sbr.rel (!%p13_p5) target bundleno = 1 (0x1), region = 82 }

</bundles_post_ra>
